<compile_context>
chip_gen: v7x
topology: tpu7x:2x2x1
jax: 0.10.0
libtpu: 0.0.40
codegen_flags: <defaults>
</compile_context>

<pallas_src>
import functools

import jax
import jax.numpy as jnp
from jax.experimental import pallas as pl
from jax.experimental.pallas import tpu as pltpu


def _gdn_fwd_kernel(x_ref, scale_ref, o_ref):
    # x_ref:     (TILE_R, TILE_L)
    # scale_ref: (TILE_R, 1)   -> broadcasts over the lane axis
    # o_ref:     (TILE_R, TILE_L)
    o_ref[...] = jnp.tanh(x_ref[...]) * scale_ref[...]


def _pick_tile(dim: int, unit: int, max_tile: int) -> int:
    """Largest multiple of `unit` that divides `dim`, capped at `max_tile`.
    Falls back to the full dim when `dim` is not a multiple of `unit`
    (legal block: full-extent dim; only a perf concern, not correctness)."""
    if dim <= 0 or dim % unit != 0:
        return dim
    cap = min(max_tile, dim)
    t = (cap // unit) * unit
    while t >= unit:
        if dim % t == 0:
            return t
        t -= unit
    return dim


def gdn_forward(x_nchw: jax.Array, beta: jax.Array, *, inverse: bool = False) -> jax.Array:
    """GDN forward. x_nchw: (N, C, H, W) float32. beta: (C,) float32."""
    N, C, H, W = x_nchw.shape
    R = N * C
    L = H * W

    x2 = x_nchw.reshape(R, L)

    # Per-row scale computed once in the wrapper (exact f32): 1/beta or beta,
    # repeated over the batch so rows of the flattened array line up with it.
    per_ch = beta if inverse else (1.0 / beta)
    scale2 = jnp.tile(per_ch.astype(x2.dtype), N).reshape(R, 1)

    # --- tile selection -----------------------------------------------------
    # Lane axis: large multiple of 128 (<= 2048).  Sublane axis: multiple of 8
    # sized so a block is ~2 MiB of f32.
    tile_l = _pick_tile(L, 128, 2048)
    target_rows = max(8, ((2 * 1024 * 1024 // 4) // max(tile_l, 1)) // 8 * 8)
    tile_r = _pick_tile(R, 8, target_rows)

    # Guarantee >=2 parallel grid steps when possible (v7x has 2 TensorCores).
    if (R // tile_r) * (L // tile_l) == 1:
        if tile_l % 256 == 0:
            tile_l //= 2
        elif tile_r % 16 == 0:
            tile_r //= 2

    grid = (R // tile_r, L // tile_l)

    # Explicit VMEM budget: in + out blocks, double-buffered, plus slack.
    block_bytes = tile_r * tile_l * x2.dtype.itemsize
    needed = 4 * block_bytes + 4 * tile_r * x2.dtype.itemsize
    vmem_limit = min(max(2 * needed, 16 * 1024 * 1024), 48 * 1024 * 1024)

    out2 = pl.pallas_call(
        _gdn_fwd_kernel,
        out_shape=jax.ShapeDtypeStruct((R, L), x2.dtype),
        grid=grid,
        in_specs=[
            pl.BlockSpec((tile_r, tile_l), lambda i, j: (i, j)),
            pl.BlockSpec((tile_r, 1), lambda i, j: (i, 0)),
        ],
        out_specs=pl.BlockSpec((tile_r, tile_l), lambda i, j: (i, j)),
        compiler_params=pltpu.CompilerParams(
            dimension_semantics=("parallel", "parallel"),
            vmem_limit_bytes=vmem_limit,
        ),
    )(x2, scale2)

    return out2.reshape(N, C, H, W)


def make_gdn_params(ch: int, reparam_offset: float = 2.0 ** (-18)):
    """Deterministic parameter init matching GDN.build()."""
    pedestal = reparam_offset ** 2
    beta = jnp.sqrt(jnp.ones((ch,), dtype=jnp.float32) + pedestal)
    # gamma is built in the PyTorch module but unused in forward; kept for parity.
    gamma_init = 0.1
    gamma = jnp.sqrt(gamma_init * jnp.eye(ch, dtype=jnp.float32) + pedestal)
    return beta, gamma


def gdn_reference(x_nchw, beta, inverse=False):
    x = jnp.tanh(x_nchw)
    b = beta.reshape(1, -1, 1, 1)
    return x * b if inverse else x / b


if __name__ == "__main__":
    N, C, H, W = 2, 4, 16, 16
    key = jax.random.PRNGKey(0)
    x = jax.random.normal(key, (N, C, H, W), dtype=jnp.float32)

    beta, _gamma = make_gdn_params(C)

    # Non-inverse (divide) path.
    out = gdn_forward(x, beta, inverse=False)
    out = jax.block_until_ready(out)
    ref = gdn_reference(x, beta, inverse=False)
    assert out.shape == (N, C, H, W)
    assert jnp.allclose(out, ref, atol=1e-6, rtol=1e-6), "mismatch vs reference (non-inverse)"

    # Inverse (multiply) path.
    out_inv = gdn_forward(x, beta, inverse=True)
    out_inv = jax.block_until_ready(out_inv)
    ref_inv = gdn_reference(x, beta, inverse=True)
    assert jnp.allclose(out_inv, ref_inv, atol=1e-6, rtol=1e-6), "mismatch vs reference (inverse)"

    print("KERNEL_OK")
</pallas_src>

<mosaic_0001>
module attributes {stable_mosaic.version = 11 : i64} {
  func.func @_gdn_fwd_kernel(%arg0: i32, %arg1: i32, %arg2: memref<8x128xf32, #tpu.memory_space<vmem>>, %arg3: memref<8x1xf32, #tpu.memory_space<vmem>>, %arg4: memref<8x128xf32, #tpu.memory_space<vmem>>) attributes {dimension_semantics = [#tpu.dimension_semantics<parallel>, #tpu.dimension_semantics<parallel>], iteration_bounds = array<i64: 1, 2>, scalar_prefetch = 0 : i64, scratch_operands = 0 : i64, tpu.core_type = #tpu.core_type<tc>, window_params = [{transform_indices = @transform_0, window_bounds = array<i64: 8, 128>}, {transform_indices = @transform_1, window_bounds = array<i64: 8, 1>}, {transform_indices = @transform_2, window_bounds = array<i64: 8, 128>}]} {
    %c0 = arith.constant 0 : index
    %c0_0 = arith.constant 0 : index
    %0 = vector.load %arg2[%c0, %c0_0] : memref<8x128xf32, #tpu.memory_space<vmem>>, vector<8x128xf32>
    %1 = math.tanh %0 : vector<8x128xf32>
    %c0_1 = arith.constant 0 : index
    %c0_2 = arith.constant 0 : index
    %2 = vector.load %arg3[%c0_1, %c0_2] : memref<8x1xf32, #tpu.memory_space<vmem>>, vector<8x1xf32>
    %3 = vector.broadcast %2 : vector<8x1xf32> to vector<8x128xf32>
    %4 = arith.mulf %1, %3 : vector<8x128xf32>
    %c0_3 = arith.constant 0 : index
    %c0_4 = arith.constant 0 : index
    %5 = vector.load %arg4[%c0_3, %c0_4] : memref<8x128xf32, #tpu.memory_space<vmem>>, vector<8x128xf32>
    tpu.vector_store %arg4[%c0_3, %c0_4], %4 {strides = array<i32>} : memref<8x128xf32, #tpu.memory_space<vmem>>, vector<8x128xf32>,
    return
  }
  func.func @transform_0(%arg0: i32, %arg1: i32) -> (i32, i32) {
    %c0_i32 = arith.constant 0 : i32
    return %arg0, %arg1 : i32, i32
  }
  func.func @transform_1(%arg0: i32, %arg1: i32) -> (i32, i32) {
    %c0_i32 = arith.constant 0 : i32
    %c0_i32_0 = arith.constant 0 : i32
    return %arg0, %c0_i32 : i32, i32
  }
  func.func @transform_2(%arg0: i32, %arg1: i32) -> (i32, i32) {
    %c0_i32 = arith.constant 0 : i32
    return %arg0, %arg1 : i32, i32
  }
}

</mosaic_0001>

<bundles_post_ra>
// kernel: tpu_custom_call.1
= control target key start
LH: loop header
LB: loop body
LE: loop exit
PB: predicated region body
PF: predicated region fallthrough
CT: control target
= control target key end

     0   :  { %7 = vsyncpa [#allocation3], 0  ;;  %s704_s0 = inlined_call_operand.hbm [shape: f32[8,256], index: 0, kind: input, shape index: {}]   ;;  %s705_s1 = inlined_call_operand.vmem [shape: f32[8,1], index: 1, kind: input, shape index: {}]   ;;  %s706_s2 = inlined_call_operand.hbm [shape: f32[8,256], index: 2, kind: output, shape index: {}]  }
   0x1   :  { %9 = vsyncpa [#allocation3 + $0x1], 0 }
   0x2   :  { %10 = vsyncpa [#allocation4], 0 }
   0x3   :  { %12 = vsyncpa [#allocation4 + $0x1], 0  ;;  %s529_s9 = smov 0   ;;  %s531_s10 = smov 0  }
   0x4   :  { %s533_s11 = smov 0   ;;  %s535_s12 = smov 0  }
   0x5   :  { %s537_s13 = smov 0   ;;  %s539_s14 = smov 0  }
   0x6 LB: > { %s317_s15 = sadd.s32 4294967295, %s509_s14   ;;  %s318_s16 = sadd.s32 4294967294, %s509_s14   ;;  %s509_s14 = sphi %s539_s14, %s18_s14   ;;  %s505_s13 = sphi %s537_s13, %s722_s13   ;;  %s501_s12 = sphi %s535_s12, %s721_s12   ;;  %s497_s11 = sphi %s533_s11, %s720_s11   ;;  %s493_s10 = sphi %s531_s10, %s719_s10   ;;  %s489_s9 = sphi %s529_s9, %s718_s9  }
   0x7   : > { %s27_s17 = sadd.s32 1, %s505_s13  ;;  %s39_s18 = sadd.s32 1, %s497_s11 }
   0x8   : > { %p28_p0 = scmp.ge.s32.totalorder %s27_s17, 2  ;;  %p46_p1 = scmp.ne.s32.totalorder %s497_s11, %s493_s10 }
   0x9   : > { %p47_p2 = scmp.eq.s32.totalorder %s509_s14, 0  ;;  %p52_p3 = scmp.ne.s32.totalorder %s493_s10, %s489_s9 }
   0xa   : > { %s724_s17 = smov (%p28_p0, %s27_s17), 0  ;;  %p53_p5 = scmp.eq.s32.totalorder %s317_s15, 0 }
   0xb   : > { %p570_p4 = por %p47_p2, %p46_p1  ;;  %s35_s20 = ssub.s32 %s505_s13, %s724_s17 }
   0xc   : > { %p104_p6 = scmp.eq.s32.totalorder %s317_s15, 1  ;;  %p37_p7 = scmp.eq.s32.totalorder %s35_s20, 0 }
   0xd   : > { %p576_p8 = por %p53_p5, %p52_p3  ;;  %p110_p10 = scmp.eq.s32.totalorder %s318_s16, 1 }
   0xe   : > { %p580_p9 = por %p104_p6, %p46_p1  ;;  %p343_p13 = scmp.lt.s32.totalorder %s509_s14, 2 }
   0xf   : > { %s585_s23 = scalar_select %p37_p7, %s497_s11, %s39_s18  }
  0x10   : > { %s710_s22 = scalar_select %p580_p9, 1, 0 }
  0x11   : > { %p587_p11 = por %p110_p10, %p52_p3  ;;  %s137_s25 = sand.u32 1, %s497_s11  }
  0x12   : > { %s322_s26 = sshll.u32 %s137_s25, 3  ;;  %s323_s27 = sshll.u32 %s505_s13, 7 }
  0x13   : > { %s711_s24 = scalar_select %p587_p11, 1, 0 }
  0x14   : > { %s598_s30 = scalar_lea.hbm %s704_s0, %s323_s27  ;;  %s141_s3 = scalar_lea.vmem [#allocation2], %s322_s26 }
  0x15   : > { %s150_s4 = sshll.u32 %s141_s3, 4  ;;  %p604_p0 = pnand %p343_p13, %p570_p4  ;;  %s600_s4 = int_to_ptr.vmem [resolvable:$true] %s150_s4 }
  0x16   : > { %s138_s6 = scalar_lea.sflag [#allocation3], %s137_s25  ;;  %s397_s7 = scalar_lea.hbm %s598_s30, 128 }
  0x17   : > { %p398_p3 = scmp.ne.s32.totalorder %s598_s30, %s397_s7  ;;  %p399_p5 = pneg %p604_p0 }
  0x18   : > { %s402_s16 = scalar_lea.hbm %s704_s0, 256  ;;  %p403_p4 = scmp.lt.u32.totalorder %s598_s30, %s704_s0 }
  0x19   : > { %p400_p6 = pnand %p399_p5, %p398_p3  ;;  %p404_p10 = scmp.lt.u32.totalorder %s402_s16, %s397_s7 }
  0x1a   : > { %p406_p12 = scmp.lt.u32.totalorder %s397_s7, %s598_s30 }
  0x1b   : > { %p401_p7 = pneg %p400_p6  ;;  %p405_p13 = por %p404_p10, %p403_p4 }
  0x1d   : > { %p407_p1 = por %p406_p12, %p405_p13 }
  0x1f   : > { %p408_p2 = pnand %p407_p1, %p401_p7 }
  0x21   : > { %411 = shalt.err (!%p408_p2)
}
  0x22   : > { %s412_s20 = scalar_lea.vmem %s600_s4, 128  ;;  %s511_s25 = smov [#allocation2]  }
  0x23   : > { %p413_p3 = scmp.ne.s32.totalorder %s600_s4, %s412_s20  ;;  %s417_s26 = sshll.u32 %s511_s25, 4  ;;  %s418_s26 = int_to_ptr.vmem [resolvable:$false] %s417_s26 }
  0x24   : > { %s419_s27 = scalar_lea.vmem %s418_s26, 256  ;;  %p420_p9 = scmp.lt.s32.totalorder %s600_s4, %s418_s26 }
  0x25   : > { %p415_p6 = pnand %p413_p3, %p399_p5  ;;  %p421_p4 = scmp.lt.s32.totalorder %s419_s27, %s412_s20 }
  0x27   : > { %p416_p11 = pneg %p415_p6  ;;  %p422_p10 = por %p421_p4, %p420_p9 }
  0x29   : > { %p423_p12 = pnand %p422_p10, %p416_p11 }
  0x2b   : > { %426 = shalt.err (!%p423_p12)
}
  0x2c   : > { %338 = dma.hbm_to_vmem [thread:$0]  (!%p604_p0), %s598_s30, 128, %s600_s4, %s138_s6  }
  0x2d   : > { %p713_p1 = scmp.lt.s32.totalorder %s509_s14, 3  ;;  %p714_p2 = scmp.ge.s32.totalorder %s509_s14, 1 }
  0x2f   : > { %p156_p5 = pnand %p714_p2, %p713_p1 }
  0x30   : > { %s640_s28 = sand.u32 (!%p156_p5), 1, %s493_s10  }
  0x31   : > { %159 = sbr.rel (%p156_p5) target bundleno = 203 (0xcb), region = 28  ;;  %s325_s29 = sshll.u32 (!%p156_p5), %s640_s28, 3 }
  0x32   : > { %s162_s3 = scalar_lea.sflag (!%p156_p5), [#allocation3], %s640_s28  ;;  %s165_s7 = scalar_lea.vmem (!%p156_p5), [#allocation2], %s325_s29 }
  0x38   : > { %480 = dma.done.wait (%p576_p8), %s162_s3, 128  }
  0x39   : > { %482 = vsyncadd (%p576_p8), %s162_s3, 4294967168  ;;  %v512_v0 = vmov 0   ;;  %v196_v1 = vld [vmem:[%s705_s1] sm:$0xff]  ;;  %s328_s5 = sshll.u32 %s501_s12, 7  ;;  %s189_s6 = scalar_lea.vmem [#allocation5], %s325_s29 }
  0x3a   : > { %394 = vset.pattern.permute.xlu0 %v512_v0  ;;  %v194_v2 = vld [vmem:[%s165_s7] sm:$0xff]  ;;  %s220_s8 = sshll.u32 %s189_s6, 4  ;;  %s655_s16 = scalar_lea.hbm %s706_s2, %s328_s5  ;;  %s657_s8 = int_to_ptr.vmem [resolvable:$true] %s220_s8 }
  0x3b   : > { %199 = vperm.xlu0 %394, %v196_v1   ;;  %395 = vtanh.f32 %v194_v2  ;;  %s205_s18 = scalar_lea.sflag [#allocation4], %s640_s28  ;;  %s427_s19 = scalar_lea.vmem %s657_s8, 128 }
  0x3c   : > { %p428_p8 = scmp.ne.s32.totalorder %s657_s8, %s427_s19  ;;  %p715_p9 = scmp.ne.s32.totalorder %s710_s22, 0 }
  0x3d   : > { %s513_s12 = smov [#allocation5]  }
  0x3e   : > { %p429_p11 = pnand %p428_p8, %p715_p9  ;;  %s431_s20 = sshll.u32 %s513_s12, 4  ;;  %s432_s20 = int_to_ptr.vmem [resolvable:$false] %s431_s20 }
  0x3f   : > { %s433_s25 = scalar_lea.vmem %s432_s20, 256  ;;  %p434_p7 = scmp.lt.s32.totalorder %s657_s8, %s432_s20 }
  0x40   : > { %p430_p0 = pneg %p429_p11  ;;  %p435_p13 = scmp.lt.s32.totalorder %s433_s25, %s427_s19 }
  0x42   : > { %p436_p3 = por %p435_p13, %p434_p7 }
  0x44   : > { %p437_p6 = pnand %p436_p3, %p430_p0 }
  0x45   : > { %v396_v3 = vpop.eup %395 }
  0xba   : > { %v200_v4 = vpop.permute.xlu0 %199 }
  0xbb   : > { %v202_v5 = vmul.f32 %v396_v3, %v200_v4 }
  0xbd   : > { %203 = vst [vmem:[%s189_s6] sm:$0xff] %v202_v5 }
  0xbe   : > { %440 = shalt.err (!%p437_p6)
}
  0xbf   : > { %s441_s26 = scalar_lea.hbm %s655_s16, 128  ;;  %s445_s29 = scalar_lea.hbm %s706_s2, 256 }
  0xc0   : > { %p442_p4 = scmp.ne.s32.totalorder %s655_s16, %s441_s26  ;;  %p446_p1 = scmp.lt.u32.totalorder %s655_s16, %s706_s2 }
  0xc1   : > { %p447_p2 = scmp.lt.u32.totalorder %s445_s29, %s441_s26  ;;  %p449_p8 = scmp.lt.u32.totalorder %s441_s26, %s655_s16 }
  0xc2   : > { %p443_p10 = pnand %p442_p4, %p715_p9 }
  0xc3   : > { %p448_p5 = por %p447_p2, %p446_p1 }
  0xc4   : > { %p444_p12 = pneg %p443_p10 }
  0xc5   : > { %p450_p11 = por %p449_p8, %p448_p5 }
  0xc7   : > { %p451_p0 = pnand %p450_p11, %p444_p12 }
  0xc9   : > { %454 = shalt.err (!%p451_p0)
}
  0xca   : > { %333 = dma.vmem_to_hbm [thread:$0]  (%p715_p9), %s657_s8, 128, %s655_s16, %s205_s18  }
  0xcb PF: > { %s232_s30 = sand.u32 1, %s489_s9   ;;  %p716_p7 = scmp.ne.s32.totalorder %s711_s24, 0 }
  0xcc   : > { %p717_p13 = scmp.ge.s32.totalorder %s509_s14, 2  ;;  %s233_s4 = scalar_lea.sflag [#allocation4], %s232_s30 }
  0xce   : > { %p340_p3 = pnand %p717_p13, %p716_p7 }
  0xd0   : > { %484 = dma.done.wait (!%p340_p3), %s233_s4, 128  }
  0xd1   : > { %486 = vsyncadd (!%p340_p3), %s233_s4, 4294967168  ;;  %s18_s14 = sadd.s32 1, %s509_s14   ;;  %s718_s9 = smov %s493_s10 }
  0xd2   : > { %p15_p6 = scmp.ge.s32.totalorder %s18_s14, 4   ;;  %s719_s10 = smov %s497_s11 }
  0xd3   : > { %s720_s11 = smov %s585_s23  ;;  %s721_s12 = smov %s505_s13 }
  0xd4   : > { %s722_s13 = smov %s724_s17  ;;  %17 = sbr.rel (!%p15_p6) target bundleno = 6 (0x6), region = 76 }
  0xdb   :  { %238 = vsyncpa [#allocation3], 1 }
  0xdc   :  { %240 = vsyncpa [#allocation3 + $0x1], 1 }
  0xdd   :  { %241 = vsyncpa [#allocation4], 1 }
  0xde   :  { %243 = vsyncpa [#allocation4 + $0x1], 1 }

</bundles_post_ra>
